<compile_context>
chip_gen: v7x
topology: tpu7x:2x2x1
jax: 0.10.0
libtpu: 0.0.40
codegen_flags: <defaults>
</compile_context>

<pallas_src>
import functools
import math

import jax
import jax.numpy as jnp
from jax.experimental import pallas as pl
from jax.experimental.pallas import tpu as pltpu

EPS = 1e-5


def _round_up(x, m):
    return ((x + m - 1) // m) * m


def _dense_residual_kernel(x_ref, h0_ref, w_ref, gamma_ref, beta_ref, o_ref,
                           sum_ref, sumsq_ref, scale_ref, shift_ref,
                           *, n_true: int, add_residual: bool):
    phase = pl.program_id(0)   # 0 = accumulate stats, 1 = normalize + store
    i = pl.program_id(1)       # row-tile index

    @pl.when((phase == 0) & (i == 0))
    def _init():
        sum_ref[...] = jnp.zeros_like(sum_ref)
        sumsq_ref[...] = jnp.zeros_like(sumsq_ref)

    @pl.when(phase == 0)
    def _accumulate():
        support = x_ref[...] + h0_ref[...]
        z = jnp.dot(support, w_ref[...], preferred_element_type=jnp.float32)
        sum_ref[...] += jnp.sum(z, axis=0, keepdims=True)
        sumsq_ref[...] += jnp.sum(z * z, axis=0, keepdims=True)

    @pl.when((phase == 1) & (i == 0))
    def _finalize_stats():
        inv_n = 1.0 / float(n_true)          # true N, not padded N
        mean = sum_ref[...] * inv_n
        var = jnp.maximum(sumsq_ref[...] * inv_n - mean * mean, 0.0)
        scale = jax.lax.rsqrt(var + EPS) * gamma_ref[...]
        scale_ref[...] = scale
        shift_ref[...] = beta_ref[...] - mean * scale

    @pl.when(phase == 1)
    def _normalize():
        support = x_ref[...] + h0_ref[...]
        z = jnp.dot(support, w_ref[...], preferred_element_type=jnp.float32)
        y = z * scale_ref[...] + shift_ref[...]
        if add_residual:                      # static flag (in_features == out_features)
            y = y + x_ref[...]
        o_ref[...] = y.astype(o_ref.dtype)


def _choose_tile_n(n, k_pad, f_pad, streamed_budget_bytes=16 * 1024 * 1024):
    """Largest multiple-of-8 row tile whose double-buffered streamed footprint
    (x, h0 tiles of width k_pad + out tile of width f_pad, f32) fits the budget.
    Budget is sized to stay comfortably under v7x's 64 MiB per-TC VMEM."""
    per_row = 4 * 2 * (2 * k_pad + f_pad)          # f32, x2 buffers
    tile = max(8, min(1024, (streamed_budget_bytes // per_row) // 8 * 8))
    tile = min(tile, _round_up(max(n, 1), 8))
    return tile


def dense_residual_layer(x, h0, weight, gamma, beta, *, tile_n=None):
    """x, h0: (N, in_features); weight: (in_features, out_features);
    gamma, beta: (1, out_features). Returns (N, out_features) float32."""
    n, in_f = x.shape
    assert h0.shape == (n, in_f)
    k_w, out_f = weight.shape
    assert k_w == in_f
    add_residual = (in_f == out_f)

    # Lane-dense feature padding (multiples of 128).
    k_pad = _round_up(in_f, 128)
    f_pad = _round_up(out_f, 128)

    if tile_n is None:
        tile_n = _choose_tile_n(n, k_pad, f_pad)
    tile_n = max(8, _round_up(tile_n, 8))
    n_pad = _round_up(n, tile_n)
    num_tiles = n_pad // tile_n

    f32 = jnp.float32
    xp = jnp.pad(x.astype(f32), ((0, n_pad - n), (0, k_pad - in_f)))
    h0p = jnp.pad(h0.astype(f32), ((0, n_pad - n), (0, k_pad - in_f)))
    wp = jnp.pad(weight.astype(f32), ((0, k_pad - in_f), (0, f_pad - out_f)))
    gp = jnp.pad(gamma.astype(f32).reshape(1, out_f),
                 ((0, 0), (0, f_pad - out_f)), constant_values=1.0)
    bp = jnp.pad(beta.astype(f32).reshape(1, out_f),
                 ((0, 0), (0, f_pad - out_f)))

    kernel = functools.partial(_dense_residual_kernel,
                               n_true=n, add_residual=add_residual)

    # Explicit scoped-VMEM request: resident weight/affine/scratch + streamed
    # double-buffered tiles, with headroom; capped well below v7x's 64 MiB.
    resident_bytes = 4 * (k_pad * f_pad + 6 * f_pad)
    streamed_bytes = 4 * 2 * tile_n * (2 * k_pad + f_pad)
    vmem_limit = int(min(max(resident_bytes + streamed_bytes + (4 << 20),
                             24 << 20), 48 << 20))

    cost = pl.CostEstimate(
        flops=2 * 2 * n_pad * k_pad * f_pad,           # matmul runs in both phases
        transcendentals=0,
        bytes_accessed=4 * (2 * 2 * n_pad * k_pad      # x, h0 read in both phases
                            + k_pad * f_pad            # weight once
                            + 2 * f_pad                # gamma, beta
                            + n_pad * f_pad),          # output write
    )

    out_padded = pl.pallas_call(
        kernel,
        out_shape=jax.ShapeDtypeStruct((n_pad, f_pad), f32),
        grid_spec=pltpu.PrefetchScalarGridSpec(
            num_scalar_prefetch=0,
            grid=(2, num_tiles),                       # (phase, row tile)
            in_specs=[
                pl.BlockSpec((tile_n, k_pad), lambda p, i: (i, 0)),  # x  (streamed)
                pl.BlockSpec((tile_n, k_pad), lambda p, i: (i, 0)),  # h0 (streamed)
                pl.BlockSpec((k_pad, f_pad), lambda p, i: (0, 0)),   # weight (resident)
                pl.BlockSpec((1, f_pad), lambda p, i: (0, 0)),       # gamma  (resident)
                pl.BlockSpec((1, f_pad), lambda p, i: (0, 0)),       # beta   (resident)
            ],
            # Phase 0 keeps the output window pinned to block 0 (no writeback
            # while only stats are accumulated); phase 1 streams one tile/step.
            out_specs=pl.BlockSpec((tile_n, f_pad), lambda p, i: (i * p, 0)),
            scratch_shapes=[
                pltpu.VMEM((1, f_pad), f32),   # sum
                pltpu.VMEM((1, f_pad), f32),   # sum of squares
                pltpu.VMEM((1, f_pad), f32),   # fused scale
                pltpu.VMEM((1, f_pad), f32),   # fused shift
            ],
        ),
        compiler_params=pltpu.CompilerParams(
            dimension_semantics=("arbitrary", "arbitrary"),
            vmem_limit_bytes=vmem_limit,
        ),
        cost_estimate=cost,
    )(xp, h0p, wp, gp, bp)

    return out_padded[:n, :out_f]


if __name__ == "__main__":
    # Small shapes consistent with the module; N is NOT a multiple of the row
    # tile (exercises row padding) and in_features == out_features (exercises
    # the residual branch).
    N = 24
    IN_FEATURES = 32
    OUT_FEATURES = 32
    TILE_N = 16          # forces a 2-row-tile grid at this demo size

    key = jax.random.PRNGKey(0)
    kx, kh, kw = jax.random.split(key, 3)

    x = jax.random.normal(kx, (N, IN_FEATURES), dtype=jnp.float32)
    h0 = jax.random.normal(kh, (N, IN_FEATURES), dtype=jnp.float32)

    # reset_parameters(): weight ~ U(-stdv, stdv), stdv = 1/sqrt(out_features)
    stdv = 1.0 / math.sqrt(OUT_FEATURES)
    weight = jax.random.uniform(kw, (IN_FEATURES, OUT_FEATURES),
                                dtype=jnp.float32, minval=-stdv, maxval=stdv)

    # BatchNorm1d affine params at fresh init: gamma=1, beta=0.
    gamma = jnp.ones((1, OUT_FEATURES), dtype=jnp.float32)
    beta = jnp.zeros((1, OUT_FEATURES), dtype=jnp.float32)

    out = dense_residual_layer(x, h0, weight, gamma, beta, tile_n=TILE_N)
    jax.block_until_ready(out)

    # Pure-JAX reference (training-mode batch norm, biased variance).
    support = x + h0
    z = support @ weight
    mean = z.mean(axis=0, keepdims=True)
    var = ((z - mean) ** 2).mean(axis=0, keepdims=True)
    ref = (z - mean) / jnp.sqrt(var + EPS) * gamma + beta
    ref = ref + x  # in_features == out_features

    assert out.shape == ref.shape
    assert jnp.allclose(out, ref, atol=1e-4, rtol=1e-4), "mismatch vs reference"

    print("KERNEL_OK")
</pallas_src>

<mosaic_0001>
module attributes {stable_mosaic.version = 11 : i64} {
  func.func @_dense_residual_kernel(%arg0: i32, %arg1: i32, %arg2: memref<16x128xf32, #tpu.memory_space<vmem>>, %arg3: memref<16x128xf32, #tpu.memory_space<vmem>>, %arg4: memref<128x128xf32, #tpu.memory_space<vmem>>, %arg5: memref<1x128xf32, #tpu.memory_space<vmem>>, %arg6: memref<1x128xf32, #tpu.memory_space<vmem>>, %arg7: memref<16x128xf32, #tpu.memory_space<vmem>>, %arg8: memref<1x128xf32, #tpu.memory_space<vmem>>, %arg9: memref<1x128xf32, #tpu.memory_space<vmem>>, %arg10: memref<1x128xf32, #tpu.memory_space<vmem>>, %arg11: memref<1x128xf32, #tpu.memory_space<vmem>>) attributes {dimension_semantics = [#tpu.dimension_semantics<arbitrary>, #tpu.dimension_semantics<arbitrary>], iteration_bounds = array<i64: 2, 2>, scalar_prefetch = 0 : i64, scratch_operands = 4 : i64, tpu.core_type = #tpu.core_type<tc>, window_params = [{transform_indices = @transform_0, window_bounds = array<i64: 16, 128>}, {transform_indices = @transform_1, window_bounds = array<i64: 16, 128>}, {pipeline_mode = #tpu.pipeline_mode<synchronous>, transform_indices = @transform_2, window_bounds = array<i64: 128, 128>}, {pipeline_mode = #tpu.pipeline_mode<synchronous>, transform_indices = @transform_3, window_bounds = array<i64: 1, 128>}, {pipeline_mode = #tpu.pipeline_mode<synchronous>, transform_indices = @transform_4, window_bounds = array<i64: 1, 128>}, {transform_indices = @transform_5, window_bounds = array<i64: 16, 128>}]} {
    %c0_i32 = arith.constant 0 : i32
    %0 = arith.cmpi eq, %arg0, %c0_i32 : i32
    %c0_i32_0 = arith.constant 0 : i32
    %1 = arith.cmpi eq, %arg1, %c0_i32_0 : i32
    %2 = arith.andi %0, %1 : i1
    %3 = arith.extui %2 : i1 to i32
    %c0_i32_1 = arith.constant 0 : i32
    %4 = arith.cmpi ne, %3, %c0_i32_1 : i32
    scf.if %4 {
      %cst = arith.constant 0.000000e+00 : f32
      %16 = vector.broadcast %cst : f32 to vector<1x128xf32>
      %c0 = arith.constant 0 : index
      %c0_8 = arith.constant 0 : index
      %17 = vector.load %arg8[%c0, %c0_8] : memref<1x128xf32, #tpu.memory_space<vmem>>, vector<1x128xf32>
      tpu.vector_store %arg8[%c0, %c0_8], %16 {strides = array<i32>} : memref<1x128xf32, #tpu.memory_space<vmem>>, vector<1x128xf32>,
      %cst_9 = arith.constant 0.000000e+00 : f32
      %18 = vector.broadcast %cst_9 : f32 to vector<1x128xf32>
      %c0_10 = arith.constant 0 : index
      %c0_11 = arith.constant 0 : index
      %19 = vector.load %arg9[%c0_10, %c0_11] : memref<1x128xf32, #tpu.memory_space<vmem>>, vector<1x128xf32>
      tpu.vector_store %arg9[%c0_10, %c0_11], %18 {strides = array<i32>} : memref<1x128xf32, #tpu.memory_space<vmem>>, vector<1x128xf32>,
    } else {
    }
    %c0_i32_2 = arith.constant 0 : i32
    %5 = arith.cmpi eq, %arg0, %c0_i32_2 : i32
    %6 = arith.extui %5 : i1 to i32
    %c0_i32_3 = arith.constant 0 : i32
    %7 = arith.cmpi ne, %6, %c0_i32_3 : i32
    scf.if %7 {
      %c0 = arith.constant 0 : index
      %c0_8 = arith.constant 0 : index
      %16 = vector.load %arg2[%c0, %c0_8] : memref<16x128xf32, #tpu.memory_space<vmem>>, vector<16x128xf32>
      %c0_9 = arith.constant 0 : index
      %c0_10 = arith.constant 0 : index
      %17 = vector.load %arg3[%c0_9, %c0_10] : memref<16x128xf32, #tpu.memory_space<vmem>>, vector<16x128xf32>
      %18 = arith.addf %16, %17 : vector<16x128xf32>
      %c0_11 = arith.constant 0 : index
      %c0_12 = arith.constant 0 : index
      %19 = vector.load %arg4[%c0_11, %c0_12] : memref<128x128xf32, #tpu.memory_space<vmem>>, vector<128x128xf32>
      %cst = arith.constant dense<0.000000e+00> : vector<16x128xf32>
      %20 = tpu.matmul %18, %19, %cst {dimension_numbers = #tpu.dot_dimension_numbers<[1], [0], [0], [1], [0, 0, 1, 1], [], []>} : vector<16x128xf32>, vector<128x128xf32>, vector<16x128xf32> -> vector<16x128xf32>
      %c0_13 = arith.constant 0 : index
      %c0_14 = arith.constant 0 : index
      %21 = vector.load %arg8[%c0_13, %c0_14] : memref<1x128xf32, #tpu.memory_space<vmem>>, vector<1x128xf32>
      %cst_15 = arith.constant dense<0.000000e+00> : vector<128xf32>
      %22 = vector.multi_reduction <add>, %20, %cst_15 [0] : vector<16x128xf32> to vector<128xf32>
      %23 = vector.shape_cast %22 : vector<128xf32> to vector<1x128xf32>
      %24 = arith.addf %21, %23 : vector<1x128xf32>
      %c0_16 = arith.constant 0 : index
      %c0_17 = arith.constant 0 : index
      %25 = vector.load %arg8[%c0_16, %c0_17] : memref<1x128xf32, #tpu.memory_space<vmem>>, vector<1x128xf32>
      tpu.vector_store %arg8[%c0_16, %c0_17], %24 {strides = array<i32>} : memref<1x128xf32, #tpu.memory_space<vmem>>, vector<1x128xf32>,
      %c0_18 = arith.constant 0 : index
      %c0_19 = arith.constant 0 : index
      %26 = vector.load %arg9[%c0_18, %c0_19] : memref<1x128xf32, #tpu.memory_space<vmem>>, vector<1x128xf32>
      %27 = arith.mulf %20, %20 : vector<16x128xf32>
      %cst_20 = arith.constant dense<0.000000e+00> : vector<128xf32>
      %28 = vector.multi_reduction <add>, %27, %cst_20 [0] : vector<16x128xf32> to vector<128xf32>
      %29 = vector.shape_cast %28 : vector<128xf32> to vector<1x128xf32>
      %30 = arith.addf %26, %29 : vector<1x128xf32>
      %c0_21 = arith.constant 0 : index
      %c0_22 = arith.constant 0 : index
      %31 = vector.load %arg9[%c0_21, %c0_22] : memref<1x128xf32, #tpu.memory_space<vmem>>, vector<1x128xf32>
      tpu.vector_store %arg9[%c0_21, %c0_22], %30 {strides = array<i32>} : memref<1x128xf32, #tpu.memory_space<vmem>>, vector<1x128xf32>,
    } else {
    }
    %c1_i32 = arith.constant 1 : i32
    %8 = arith.cmpi eq, %arg0, %c1_i32 : i32
    %c0_i32_4 = arith.constant 0 : i32
    %9 = arith.cmpi eq, %arg1, %c0_i32_4 : i32
    %10 = arith.andi %8, %9 : i1
    %11 = arith.extui %10 : i1 to i32
    %c0_i32_5 = arith.constant 0 : i32
    %12 = arith.cmpi ne, %11, %c0_i32_5 : i32
    scf.if %12 {
      %c0 = arith.constant 0 : index
      %c0_8 = arith.constant 0 : index
      %16 = vector.load %arg8[%c0, %c0_8] : memref<1x128xf32, #tpu.memory_space<vmem>>, vector<1x128xf32>
      %cst = arith.constant 0.0416666679 : f32
      %17 = vector.broadcast %cst : f32 to vector<1x128xf32>
      %18 = arith.mulf %16, %17 : vector<1x128xf32>
      %c0_9 = arith.constant 0 : index
      %c0_10 = arith.constant 0 : index
      %19 = vector.load %arg9[%c0_9, %c0_10] : memref<1x128xf32, #tpu.memory_space<vmem>>, vector<1x128xf32>
      %cst_11 = arith.constant 0.0416666679 : f32
      %20 = vector.broadcast %cst_11 : f32 to vector<1x128xf32>
      %21 = arith.mulf %19, %20 : vector<1x128xf32>
      %22 = arith.mulf %18, %18 : vector<1x128xf32>
      %23 = arith.subf %21, %22 : vector<1x128xf32>
      %cst_12 = arith.constant 0.000000e+00 : f32
      %24 = vector.broadcast %cst_12 : f32 to vector<1x128xf32>
      %25 = arith.maximumf %23, %24 : vector<1x128xf32>
      %cst_13 = arith.constant 9.99999974E-6 : f32
      %26 = vector.broadcast %cst_13 : f32 to vector<1x128xf32>
      %27 = arith.addf %25, %26 : vector<1x128xf32>
      %28 = math.rsqrt %27 : vector<1x128xf32>
      %c0_14 = arith.constant 0 : index
      %c0_15 = arith.constant 0 : index
      %29 = vector.load %arg5[%c0_14, %c0_15] : memref<1x128xf32, #tpu.memory_space<vmem>>, vector<1x128xf32>
      %30 = arith.mulf %28, %29 : vector<1x128xf32>
      %c0_16 = arith.constant 0 : index
      %c0_17 = arith.constant 0 : index
      %31 = vector.load %arg10[%c0_16, %c0_17] : memref<1x128xf32, #tpu.memory_space<vmem>>, vector<1x128xf32>
      tpu.vector_store %arg10[%c0_16, %c0_17], %30 {strides = array<i32>} : memref<1x128xf32, #tpu.memory_space<vmem>>, vector<1x128xf32>,
      %c0_18 = arith.constant 0 : index
      %c0_19 = arith.constant 0 : index
      %32 = vector.load %arg6[%c0_18, %c0_19] : memref<1x128xf32, #tpu.memory_space<vmem>>, vector<1x128xf32>
      %33 = arith.mulf %18, %30 : vector<1x128xf32>
      %34 = arith.subf %32, %33 : vector<1x128xf32>
      %c0_20 = arith.constant 0 : index
      %c0_21 = arith.constant 0 : index
      %35 = vector.load %arg11[%c0_20, %c0_21] : memref<1x128xf32, #tpu.memory_space<vmem>>, vector<1x128xf32>
      tpu.vector_store %arg11[%c0_20, %c0_21], %34 {strides = array<i32>} : memref<1x128xf32, #tpu.memory_space<vmem>>, vector<1x128xf32>,
    } else {
    }
    %c1_i32_6 = arith.constant 1 : i32
    %13 = arith.cmpi eq, %arg0, %c1_i32_6 : i32
    %14 = arith.extui %13 : i1 to i32
    %c0_i32_7 = arith.constant 0 : i32
    %15 = arith.cmpi ne, %14, %c0_i32_7 : i32
    scf.if %15 {
      %c0 = arith.constant 0 : index
      %c0_8 = arith.constant 0 : index
      %16 = vector.load %arg2[%c0, %c0_8] : memref<16x128xf32, #tpu.memory_space<vmem>>, vector<16x128xf32>
      %c0_9 = arith.constant 0 : index
      %c0_10 = arith.constant 0 : index
      %17 = vector.load %arg3[%c0_9, %c0_10] : memref<16x128xf32, #tpu.memory_space<vmem>>, vector<16x128xf32>
      %18 = arith.addf %16, %17 : vector<16x128xf32>
      %c0_11 = arith.constant 0 : index
      %c0_12 = arith.constant 0 : index
      %19 = vector.load %arg4[%c0_11, %c0_12] : memref<128x128xf32, #tpu.memory_space<vmem>>, vector<128x128xf32>
      %cst = arith.constant dense<0.000000e+00> : vector<16x128xf32>
      %20 = tpu.matmul %18, %19, %cst {dimension_numbers = #tpu.dot_dimension_numbers<[1], [0], [0], [1], [0, 0, 1, 1], [], []>} : vector<16x128xf32>, vector<128x128xf32>, vector<16x128xf32> -> vector<16x128xf32>
      %c0_13 = arith.constant 0 : index
      %c0_14 = arith.constant 0 : index
      %21 = vector.load %arg10[%c0_13, %c0_14] : memref<1x128xf32, #tpu.memory_space<vmem>>, vector<1x128xf32>
      %22 = vector.broadcast %21 : vector<1x128xf32> to vector<16x128xf32>
      %23 = arith.mulf %20, %22 : vector<16x128xf32>
      %c0_15 = arith.constant 0 : index
      %c0_16 = arith.constant 0 : index
      %24 = vector.load %arg11[%c0_15, %c0_16] : memref<1x128xf32, #tpu.memory_space<vmem>>, vector<1x128xf32>
      %25 = vector.broadcast %24 : vector<1x128xf32> to vector<16x128xf32>
      %26 = arith.addf %23, %25 : vector<16x128xf32>
      %c0_17 = arith.constant 0 : index
      %c0_18 = arith.constant 0 : index
      %27 = vector.load %arg2[%c0_17, %c0_18] : memref<16x128xf32, #tpu.memory_space<vmem>>, vector<16x128xf32>
      %28 = arith.addf %26, %27 : vector<16x128xf32>
      %c0_19 = arith.constant 0 : index
      %c0_20 = arith.constant 0 : index
      %29 = vector.load %arg7[%c0_19, %c0_20] : memref<16x128xf32, #tpu.memory_space<vmem>>, vector<16x128xf32>
      tpu.vector_store %arg7[%c0_19, %c0_20], %28 {strides = array<i32>} : memref<16x128xf32, #tpu.memory_space<vmem>>, vector<16x128xf32>,
    } else {
    }
    return
  }
  func.func @transform_0(%arg0: i32, %arg1: i32) -> (i32, i32) {
    %c0_i32 = arith.constant 0 : i32
    %c0_i32_0 = arith.constant 0 : i32
    return %arg1, %c0_i32 : i32, i32
  }
  func.func @transform_1(%arg0: i32, %arg1: i32) -> (i32, i32) {
    %c0_i32 = arith.constant 0 : i32
    %c0_i32_0 = arith.constant 0 : i32
    return %arg1, %c0_i32 : i32, i32
  }
  func.func @transform_2(%arg0: i32, %arg1: i32) -> (i32, i32) {
    %c0_i32 = arith.constant 0 : i32
    %c0_i32_0 = arith.constant 0 : i32
    %c0_i32_1 = arith.constant 0 : i32
    return %c0_i32, %c0_i32_0 : i32, i32
  }
  func.func @transform_3(%arg0: i32, %arg1: i32) -> (i32, i32) {
    %c0_i32 = arith.constant 0 : i32
    %c0_i32_0 = arith.constant 0 : i32
    %c0_i32_1 = arith.constant 0 : i32
    return %c0_i32, %c0_i32_0 : i32, i32
  }
  func.func @transform_4(%arg0: i32, %arg1: i32) -> (i32, i32) {
    %c0_i32 = arith.constant 0 : i32
    %c0_i32_0 = arith.constant 0 : i32
    %c0_i32_1 = arith.constant 0 : i32
    return %c0_i32, %c0_i32_0 : i32, i32
  }
  func.func @transform_5(%arg0: i32, %arg1: i32) -> (i32, i32) {
    %0 = arith.muli %arg1, %arg0 : i32
    %c0_i32 = arith.constant 0 : i32
    %c0_i32_0 = arith.constant 0 : i32
    return %0, %c0_i32 : i32, i32
  }
}

</mosaic_0001>

<bundles_post_ra>
// kernel: tpu_custom_call.1
= control target key start
LH: loop header
LB: loop body
LE: loop exit
PB: predicated region body
PF: predicated region fallthrough
CT: control target
= control target key end

     0   :  { %s1653_s0 = inlined_call_operand.hbm [shape: f32[32,128], index: 0, kind: input, shape index: {}]   ;;  %s1654_s1 = inlined_call_operand.hbm [shape: f32[32,128], index: 1, kind: input, shape index: {}]   ;;  %s1655_s2 = inlined_call_operand.hbm [shape: f32[128,128], index: 2, kind: input, shape index: {}]   ;;  %s1656_s3 = inlined_call_operand.vmem [shape: f32[1,128], index: 3, kind: input, shape index: {}]   ;;  %s1657_s4 = inlined_call_operand.vmem [shape: f32[1,128], index: 4, kind: input, shape index: {}]   ;;  %s1658_s5 = inlined_call_operand.hbm [shape: f32[32,128], index: 5, kind: output, shape index: {}]  }
   0x1   :  { %1675 = sst [smem:[#allocation26_spill]] %s1653_s0 }
   0x2   :  { %1676 = sst [smem:[#allocation27_spill]] %s1655_s2 }
   0x3   :  { %1677 = sst [smem:[#allocation28_spill]] %s1658_s5 }
   0x4   :  { %10 = vsyncpa [#allocation7], 0 }
   0x5   :  { %12 = vsyncpa [#allocation7 + $0x1], 0 }
   0x6   :  { %13 = vsyncpa [#allocation10], 0 }
   0x7   :  { %15 = vsyncpa [#allocation10 + $0x1], 0 }
   0x8   :  { %16 = vsyncpa [#allocation8], 0 }
   0x9   :  { %18 = vsyncpa [#allocation8 + $0x1], 0  ;;  %s1301_s18 = smov 0   ;;  %s1303_s19 = smov 0  }
   0xa   :  { %s1305_s20 = smov 0   ;;  %s1307_s21 = smov 0  }
   0xb   :  { %s1309_s22 = smov 0   ;;  %s1311_s23 = smov 0  }
   0xc   :  { %s1313_s24 = smov 0   ;;  %s1315_s25 = smov 0  }
   0xd   :  { %s1317_s26 = smov 0   ;;  %s1319_s27 = smov 0  }
   0xe   :  { %s1321_s28 = smov 0  }
   0xf LB: > { %1678 = sst [smem:[#allocation17_spill]] %s1220_s18  ;;  %s1355_s29 = sadd.s32 4294967295, %s1260_s28   ;;  %s1260_s28 = sphi %s1321_s28, %s24_s28   ;;  %s1256_s27 = sphi %s1319_s27, %s1714_s27   ;;  %s1252_s26 = sphi %s1317_s26, %s1713_s26   ;;  %s1248_s25 = sphi %s1315_s25, %s1712_s25   ;;  %s1244_s24 = sphi %s1313_s24, %s1711_s24   ;;  %s1240_s23 = sphi %s1311_s23, %s1720_s23   ;;  %s1236_s22 = sphi %s1309_s22, %s1719_s22   ;;  %s1232_s21 = sphi %s1307_s21, %s1718_s21   ;;  %s1228_s20 = sphi %s1305_s20, %s1717_s20   ;;  %s1224_s19 = sphi %s1303_s19, %s1716_s19   ;;  %s1220_s18 = sphi %s1301_s18, %s1715_s18  }
  0x10   : > { %1679 = sst [smem:[#allocation18_spill]] %s1240_s23  ;;  %s720_s30 = sadd.s32 4294967294, %s1260_s28  }
  0x11   : > { %1680 = sst [smem:[#allocation19_spill]] %s1252_s26  ;;  %p56_p0 = scmp.ne.s32.totalorder %s1236_s22, %s1232_s21 }
  0x12   : > { %1681 = sst [smem:[#allocation20_spill]] %s1256_s27  ;;  %p1659_p1 = scmp.eq.s32.totalorder %s1355_s29, 0 }
  0x13   : > { %p170_p2 = scmp.ne.s32.totalorder %s1228_s20, %s1224_s19  ;;  %p171_p4 = scmp.eq.s32.totalorder %s1355_s29, 3 }
  0x14   : > { %p1365_p3 = por %p1659_p1, %p56_p0  ;;  %p176_p5 = scmp.ne.s32.totalorder %s1224_s19, %s1220_s18 }
  0x15   : > { %p177_p6 = scmp.eq.s32.totalorder %s720_s30, 3  ;;  %p1372_p7 = por %p171_p4, %p170_p2 }
  0x16   : > { %s1682_s7 = scalar_select %p1365_p3, 1, 0 }
  0x17   : > { %s1683_s8 = scalar_select %p1372_p7, 1, 0 }
  0x18   : > { %p721_p8 = scmp.ge.s32.totalorder %s1260_s28, 1  ;;  %p1377_p9 = por %p177_p6, %p176_p5 }
  0x19   : > { %p184_p10 = scmp.lt.s32.totalorder %s1260_s28, 5  ;;  %s1262_s11 = smov [#allocation11]  }
  0x1a   : > { %s1684_s9 = scalar_select %p1377_p9, 1, 0 }
  0x1b   : > { %p1382_p11 = pnand %p721_p8, %p184_p10  ;;  %s196_s12 = sshll.u32 %s1262_s11, 4  ;;  %s197_s12 = int_to_ptr.vmem [resolvable:$true] %s196_s12 }
  0x1c   : > { %1685 = sst [smem:[#allocation21_spill]] %s1684_s9  ;;  %s1688_s2 = sld [smem:[#allocation27_spill]] }
  0x1d   : > { %s1686_s10 = scalar_select %p1382_p11, 1, 0 }
  0x1e   : > { %p927_p12 = pneg %p1382_p11 }
  0x20   : > { %p1390_p13 = pnand %p927_p12, %p1659_p1 }
  0x22   : > { %s1042_s16 = scalar_lea.hbm %s1688_s2, 2048  ;;  %p1044_p2 = pneg %p1390_p13 }
  0x23   : > { %p1043_p0 = scmp.ne.s32.totalorder %s1688_s2, %s1042_s16  ;;  %p1049_p6 = scmp.lt.u32.totalorder %s1042_s16, %s1688_s2 }
  0x25   : > { %p1045_p4 = pnand %p1044_p2, %p1043_p0 }
  0x27   : > { %p1046_p5 = pneg %p1045_p4 }
  0x29   : > { %p1051_p8 = pnand %p1049_p6, %p1046_p5 }
  0x2b   : > { %1054 = shalt.err (!%p1051_p8)
}
  0x2c   : > { %s1055_s6 = scalar_lea.vmem %s197_s12, 2048  ;;  %p1063_p9 = scmp.lt.s32.totalorder %s197_s12, %s197_s12 }
  0x2d   : > { %p1056_p10 = scmp.ne.s32.totalorder %s197_s12, %s1055_s6  ;;  %p1064_p7 = scmp.lt.s32.totalorder %s1055_s6, %s1055_s6 }
  0x2f   : > { %p1058_p12 = pnand %p1056_p10, %p1044_p2  ;;  %p1065_p3 = por %p1064_p7, %p1063_p9 }
  0x31   : > { %p1059_p1 = pneg %p1058_p12 }
  0x33   : > { %p1066_p11 = pnand %p1065_p3, %p1059_p1 }
  0x35   : > { %1069 = shalt.err (!%p1066_p11)
}
  0x36   : > { %s1663_s14 = smov 128   ;;  %s1665_s15 = smov 8  }
  0x37   : > { %930 = dma.hbm_to_vmem [thread:$0]  (!%p1390_p13), %s1688_s2, 2048, %s197_s12, [#allocation10], %s1663_s14, %s1663_s14, %s1665_s15  }
  0x38   : > { %s33_s17 = sadd.s32 1, %s1252_s26  ;;  %s36_s21 = sadd.s32 1, %s1256_s27 }
  0x39   : > { %p34_p1 = scmp.ge.s32.totalorder %s33_s17, 2  ;;  %s43_s30 = sadd.s32 1, %s1240_s23 }
  0x3a   : > { %p50_p3 = scmp.ne.s32.totalorder %s1240_s23, %s1236_s22  ;;  %p51_p7 = scmp.eq.s32.totalorder %s1260_s28, 0 }
  0x3b   : > { %s1722_s17 = smov (%p34_p1, %s33_s17), 0  ;;  %s1724_s21 = smov (!%p34_p1, %s36_s21), %s1256_s27 }
  0x3c   : > { %1689 = sst [smem:[#allocation22_spill]] %s1722_s17  ;;  %s40_s13 = ssub.s32 %s1252_s26, %s1722_s17 }
  0x3d   : > { %p38_p9 = scmp.ge.s32.totalorder %s1724_s21, 2  ;;  %p41_p11 = scmp.eq.s32.totalorder %s40_s13, 0 }
  0x3e   : > { %p1424_p13 = por %p51_p7, %p50_p3  ;;  %s155_s11 = smul.u32 %s1252_s26, %s1256_s27 }
  0x3f   : > { %s1726_s21 = smov (%p38_p9, %s1724_s21), 0  ;;  %p943_p0 = scmp.lt.s32.totalorder %s1260_s28, 4 }
  0x40   : > { %1691 = sst [smem:[#allocation23_spill]] %s1726_s21  ;;  %s156_s16 = smul.u32 %s1726_s21, %s1722_s17 }
  0x41   : > { %s1433_s6 = scalar_select %p41_p11, %s1240_s23, %s43_s30  }
  0x42   : > { %s216_s14 = sand.u32 1, %s1240_s23   ;;  %s744_s15 = sshll.u32 %s1252_s26, 8 }
  0x43   : > { %1692 = sst [smem:[#allocation24_spill]] %s1433_s6  ;;  %s157_s2 = ssub.s32 %s155_s11, %s156_s16 }
  0x44   : > { %p158_p2 = scmp.eq.s32.totalorder %s157_s2, 0  ;;  %s1440_s9 = sshll.u32 %s216_s14, 4 }
  0x45   : > { %s1693_s0 = sld [smem:[#allocation26_spill]]  ;;  %s1694_s27 = sadd.s32 1, %s1228_s20 }
  0x46   : > { %s1450_s30 = scalar_select %p158_p2, %s1228_s20, %s1694_s27  }
  0x47   : > { %s220_s21 = scalar_lea.vmem [#allocation6], %s1440_s9  ;;  %p1455_p4 = pnand %p943_p0, %p1424_p13 }
  0x48   : > { %1695 = sst [smem:[#allocation25_spill]] %s1450_s30  ;;  %s227_s17 = sshll.u32 %s220_s21, 4  ;;  %s1459_s17 = int_to_ptr.vmem [resolvable:$true] %s227_s17 }
  0x49   : > { %s1464_s16 = scalar_lea.hbm %s1654_s1, %s744_s15  ;;  %s1466_s13 = scalar_lea.sflag [#allocation7], %s216_s14 }
  0x4a   : > { %p1072_p6 = pneg %p1455_p4 }
  0x4b   : > { %s1445_s5 = scalar_lea.hbm %s1693_s0, %s744_s15  ;;  %s1075_s26 = scalar_lea.hbm %s1693_s0, 512 }
  0x4c   : > { %s1070_s27 = scalar_lea.hbm %s1445_s5, 256  ;;  %p1076_p12 = scmp.lt.u32.totalorder %s1445_s5, %s1693_s0 }
  0x4d   : > { %p1071_p5 = scmp.ne.s32.totalorder %s1445_s5, %s1070_s27  ;;  %p1077_p1 = scmp.lt.u32.totalorder %s1075_s26, %s1070_s27 }
  0x4e   : > { %p1079_p7 = scmp.lt.u32.totalorder %s1070_s27, %s1445_s5 }
  0x4f   : > { %p1073_p8 = pnand %p1072_p6, %p1071_p5  ;;  %p1078_p3 = por %p1077_p1, %p1076_p12 }
  0x51   : > { %p1074_p10 = pneg %p1073_p8  ;;  %p1080_p9 = por %p1079_p7, %p1078_p3 }
  0x53   : > { %p1081_p11 = pnand %p1080_p9, %p1074_p10 }
  0x55   : > { %1084 = shalt.err (!%p1081_p11)
}
  0x56   : > { %s1085_s14 = scalar_lea.vmem %s1459_s17, 256  ;;  %s1265_s15 = smov [#allocation6]  }
  0x57   : > { %p1086_p13 = scmp.ne.s32.totalorder %s1459_s17, %s1085_s14  ;;  %s1090_s18 = sshll.u32 %s1265_s15, 4  ;;  %s1091_s18 = int_to_ptr.vmem [resolvable:$false] %s1090_s18 }
  0x58   : > { %s1092_s23 = scalar_lea.vmem %s1091_s18, 512  ;;  %p1093_p5 = scmp.lt.s32.totalorder %s1459_s17, %s1091_s18 }
  0x59   : > { %p1088_p0 = pnand %p1086_p13, %p1072_p6  ;;  %p1094_p8 = scmp.lt.s32.totalorder %s1092_s23, %s1085_s14 }
  0x5b   : > { %p1089_p2 = pneg %p1088_p0  ;;  %p1095_p12 = por %p1094_p8, %p1093_p5 }
  0x5d   : > { %p1096_p1 = pnand %p1095_p12, %p1089_p2 }
  0x5f   : > { %1099 = shalt.err (!%p1096_p1)
}
  0x60   : > { %s1697_s26 = smov 8   ;;  %s1698_s6 = smov 128  }
  0x61   : > { %934 = dma.hbm_to_vmem [thread:$0]  (!%p1455_p4), %s1445_s5, 256, %s1459_s17, %s1466_s13, %s1698_s6, %s1698_s6, %s1697_s26  }
  0x62   : > { %s241_s11 = scalar_lea.vmem [#allocation9], %s1440_s9  ;;  %s237_s21 = sand.u32 1, %s1260_s28  }
  0x63   : > { %s248_s27 = sshll.u32 %s241_s11, 4  ;;  %s1501_s12 = scalar_lea.sflag [#allocation10], %s237_s21  ;;  %s1499_s27 = int_to_ptr.vmem [resolvable:$true] %s248_s27 }
  0x64   : > { %s1100_s14 = scalar_lea.hbm %s1464_s16, 256  ;;  %s1105_s23 = scalar_lea.hbm %s1654_s1, 512 }
  0x65   : > { %p1101_p10 = scmp.ne.s32.totalorder %s1464_s16, %s1100_s14  ;;  %p1106_p9 = scmp.lt.u32.totalorder %s1464_s16, %s1654_s1 }
  0x66   : > { %p1107_p11 = scmp.lt.u32.totalorder %s1105_s23, %s1100_s14  ;;  %p1109_p0 = scmp.lt.u32.totalorder %s1100_s14, %s1464_s16 }
  0x67   : > { %p1103_p3 = pnand %p1101_p10, %p1072_p6 }
  0x68   : > { %p1108_p13 = por %p1107_p11, %p1106_p9 }
  0x69   : > { %p1104_p7 = pneg %p1103_p3 }
  0x6a   : > { %p1110_p2 = por %p1109_p0, %p1108_p13 }
  0x6c   : > { %p1111_p5 = pnand %p1110_p2, %p1104_p7 }
  0x6e   : > { %1114 = shalt.err (!%p1111_p5)
}
  0x6f   : > { %s1115_s5 = scalar_lea.vmem %s1499_s27, 256  ;;  %s1266_s9 = smov [#allocation9]  }
  0x70   : > { %p1116_p8 = scmp.ne.s32.totalorder %s1499_s27, %s1115_s5  ;;  %s1120_s17 = sshll.u32 %s1266_s9, 4  ;;  %s1121_s17 = int_to_ptr.vmem [resolvable:$false] %s1120_s17 }
  0x71   : > { %s1122_s0 = scalar_lea.vmem %s1121_s17, 512  ;;  %p1123_p10 = scmp.lt.s32.totalorder %s1499_s27, %s1121_s17 }
  0x72   : > { %p1118_p12 = pnand %p1116_p8, %p1072_p6  ;;  %p1124_p3 = scmp.lt.s32.totalorder %s1122_s0, %s1115_s5 }
  0x74   : > { %p1119_p1 = pneg %p1118_p12  ;;  %p1125_p9 = por %p1124_p3, %p1123_p10 }
  0x76   : > { %p1126_p11 = pnand %p1125_p9, %p1119_p1 }
  0x78   : > { %1129 = shalt.err (!%p1126_p11)
}
  0x79   : > { %937 = dma.hbm_to_vmem [thread:$0]  (!%p1455_p4), %s1464_s16, 256, %s1499_s27, %s1501_s12, %s1698_s6, %s1698_s6, %s1697_s26  }
  0x7a   : > { %p1699_p6 = scmp.ne.s32.totalorder %s1686_s10, 0 }
  0x7b   : > { %s262_s30 = sand.u32 (!%p1699_p6), 1, %s1236_s22   ;;  %p1700_p7 = scmp.ne.s32.totalorder (!%p1699_p6), %s1682_s7, 0 }
  0x7c   : > { %260 = sbr.rel (%p1699_p6) target bundleno = 735 (0x2df), region = 40  ;;  %s731_s13 = sshll.u32 (!%p1699_p6), %s262_s30, 4 }
  0x7d   : > { %s263_s11 = scalar_lea.sflag (!%p1699_p6), [#allocation7], %s262_s30  ;;  %s1533_s21 = scalar_lea.vmem (!%p1699_p6), [#allocation6], %s731_s13 }
  0x83   : > { %1203 = dma.done.wait (%p1700_p7), %s263_s11, 256  }
  0x84   : > { %1205 = vsyncadd (%p1700_p7), %s263_s11, 4294967040  ;;  %s271_s2 = sand.u32 1, %s1355_s29   ;;  %s1540_s16 = scalar_lea.vmem [#allocation9], %s731_s13 }
  0x85   : > { %s272_s14 = scalar_lea.sflag [#allocation10], %s271_s2 }
  0x86   : > { %1207 = dma.done.wait (%p1700_p7), %s272_s14, 256  }
  0x87   : > { %1209 = vsyncadd (%p1700_p7), %s272_s14, 4294967040  ;;  %p1701_p4 = scmp.eq.s32.totalorder %s1355_s29, 0 }
  0x89   : > { %1211 = dma.done.wait (%p1701_p4), [#allocation10], 2048   ;;  %p1702_p13 = pmov %p1701_p4 }
  0x8a   : > { %s308_s10 = sand.u32 1, %s1224_s19   ;;  %p315_p0 = scmp.eq.s32.totalorder %s1248_s25, 0 }
  0x8b   : > { %1213 = vsyncadd (%p1702_p13), [#allocation10], 4294965248  ;;  %s734_s26 = sshll.u32 %s308_s10, 4  ;;  %p316_p2 = scmp.eq.s32.totalorder %s1244_s24, 0 }
  0x8c   : > { %s1557_s7 = scalar_lea.vmem [#allocation12], %s734_s26 }
  0x8d   : > { %p317_p5 = pnand %p316_p2, %p315_p0 }
  0x8e   : > { %v1267_v0 = vmov (!%p317_p5), 0.0  }
  0x8f   : > { %320 = sbr.rel (%p317_p5) target bundleno = 150 (0x96), region = 56  ;;  %321 = vst [vmem:[#allocation2] sm:$0x1] (!%p317_p5), %v1267_v0  ;;  %322 = vst [vmem:[#allocation3] sm:$0x1] (!%p317_p5), %v1267_v0 }
  0x96 PF: > { %p735_p8 = scmp.ne.s32.totalorder %s1248_s25, 0 }
  0x97   : > { %v332_v1 = vld [vmem:[#allocation11] sm:$0xff] (!%p735_p8)  ;;  %v333_v2 = vld [vmem:[#allocation11 + $0x8] sm:$0xff] (!%p735_p8)  ;;  %v334_v3 = vld [vmem:[#allocation11 + $0x10] sm:$0xff] (!%p735_p8) }
  0x98   : > { %325 = sbr.rel (%p735_p8) target bundleno = 418 (0x1a2), region = 60  ;;  %v853_v4 = vpack.c.bf16 (!%p735_p8), %v333_v2, %v332_v1  ;;  %v335_v5 = vld [vmem:[#allocation11 + $0x18] sm:$0xff] (!%p735_p8)  ;;  %v336_v7 = vld [vmem:[#allocation11 + $0x20] sm:$0xff] (!%p735_p8)  ;;  %v337_v8 = vld [vmem:[#allocation11 + $0x28] sm:$0xff] (!%p735_p8) }
  0x99   : > { %v857_v6 = vpack.c.bf16 (!%p735_p8), %v335_v5, %v334_v3  ;;  %v861_v9 = vpack.c.bf16 (!%p735_p8), %v337_v8, %v336_v7  ;;  %v326_v10 = vld [vmem:[%s1533_s21] sm:$0xff] (!%p735_p8)  ;;  %v339_v13 = vld [vmem:[#allocation11 + $0x38] sm:$0xff] (!%p735_p8)  ;;  %v341_v17 = vld [vmem:[#allocation11 + $0x48] sm:$0xff] (!%p735_p8) }
  0x9a   : > { %854 = vmatprep.subr.bf16.mxu0 (!%p735_p8), %v853_v4  ;;  %v328_v11 = vld [vmem:[%s1540_s16] sm:$0xff] (!%p735_p8)  ;;  %v343_v20 = vld [vmem:[#allocation11 + $0x58] sm:$0xff] (!%p735_p8)  ;;  %v345_v23 = vld [vmem:[#allocation11 + $0x68] sm:$0xff] (!%p735_p8) }
  0x9b   : > { %856 = vmatpush3.bf16.msra.mxu0 (!%p735_p8), %v853_v4  ;;  %v338_v12 = vld [vmem:[#allocation11 + $0x30] sm:$0xff] (!%p735_p8)  ;;  %v330_v14 = vadd.f32 (!%p735_p8), %v328_v11, %v326_v10  ;;  %v340_v16 = vld [vmem:[#allocation11 + $0x40] sm:$0xff] (!%p735_p8)  ;;  %v347_v26 = vld [vmem:[#allocation11 + $0x78] sm:$0xff] (!%p735_p8) }
  0x9c   : > { %858 = vmatprep.subr.bf16.mxu0 (!%p735_p8), %v857_v6  ;;  %v865_v15 = vpack.c.bf16 (!%p735_p8), %v339_v13, %v338_v12  ;;  %v869_v18 = vpack.c.bf16 (!%p735_p8), %v341_v17, %v340_v16  ;;  %v342_v19 = vld [vmem:[#allocation11 + $0x50] sm:$0xff] (!%p735_p8)  ;;  %v344_v22 = vld [vmem:[#allocation11 + $0x60] sm:$0xff] (!%p735_p8)  ;;  %v327_v28 = vld [vmem:[%s1533_s21 + $0x8] sm:$0xff] (!%p735_p8) }
  0x9d   : > { %815 = vmatprep.mubr.f32.mxu0 (!%p735_p8), %v330_v14  ;;  %v873_v21 = vpack.c.bf16 (!%p735_p8), %v343_v20, %v342_v19  ;;  %v877_v24 = vpack.c.bf16 (!%p735_p8), %v345_v23, %v344_v22  ;;  %v346_v25 = vld [vmem:[#allocation11 + $0x70] sm:$0xff] (!%p735_p8)  ;;  %v329_v29 = vld [vmem:[%s1540_s16 + $0x8] sm:$0xff] (!%p735_p8) }
  0x9e   : > { %v881_v27 = vpack.c.bf16 (!%p735_p8), %v347_v26, %v346_v25  ;;  %v331_v30 = vadd.f32 (!%p735_p8), %v329_v29, %v327_v28  ;;  %v423_v46 = vld [vmem:[#allocation2] sm:$0x1] (!%p735_p8)  ;;  %v433_v49 = vld [vmem:[#allocation3] sm:$0x1] (!%p735_p8) }
  0x9f   : > { %860 = vmatpush3.bf16.msra.mxu0 %v857_v6 }
  0xa0   : > { %862 = vmatprep.subr.bf16.mxu0 %v861_v9 }
  0xa3   : > { %864 = vmatpush3.bf16.msra.mxu0 %v861_v9 }
  0xa4   : > { %866 = vmatprep.subr.bf16.mxu0 %v865_v15 }
  0xa7   : > { %868 = vmatpush3.bf16.msra.mxu0 %v865_v15 }
  0xa8   : > { %870 = vmatprep.subr.bf16.mxu0 %v869_v18 }
  0xab   : > { %872 = vmatpush3.bf16.msra.mxu0 %v869_v18 }
  0xac   : > { %874 = vmatprep.subr.bf16.mxu0 %v873_v21 }
  0xaf   : > { %876 = vmatpush3.bf16.msra.mxu0 %v873_v21 }
  0xb0   : > { %878 = vmatprep.subr.bf16.mxu0 %v877_v24 }
  0xb3   : > { %880 = vmatpush3.bf16.msra.mxu0 %v877_v24 }
  0xb4   : > { %882 = vmatprep.subr.bf16.mxu0 %v881_v27 }
  0xb7   : > { %884 = vmatpush3.bf16.msra.mxu0 %v881_v27 }
  0xba   : > { %816 = vmatmul.mubr.f32.vlgmr.msra.gmra.mrb[0].mxu0 %v331_v30 }
 0x18d   : > { %v817_v31 = vpop.f32.mrb[0].mxu0 }
 0x18e   : > { %v435_v32 = vmul.f32 %v817_v31, %v817_v31  ;;  %v414_v33 = vpop.f32.mrb[1].mxu0 }
 0x18f   : > { %v424_v34 = vadd.f32 %v817_v31, %v414_v33  ;;  %v434_v35 = vmul.f32 %v414_v33, %v414_v33 }
 0x191   : > { %v425_v36 = vrot.slane %v424_v34, 4  ;;  %v436_v37 = vadd.f32 %v435_v32, %v434_v35 }
 0x193   : > { %v426_v38 = vadd.f32 %v425_v36, %v424_v34  ;;  %v437_v39 = vrot.slane %v436_v37, 4 }
 0x195   : > { %v427_v40 = vrot.slane %v426_v38, 2  ;;  %v438_v41 = vadd.f32 %v437_v39, %v436_v37 }
 0x197   : > { %v428_v42 = vadd.f32 %v427_v40, %v426_v38  ;;  %v439_v43 = vrot.slane %v438_v41, 2 }
 0x199   : > { %v429_v44 = vrot.slane %v428_v42, 1  ;;  %v440_v45 = vadd.f32 %v439_v43, %v438_v41 }
 0x19b   : > { %v430_v47 = vadd.f32 %v429_v44, %v428_v42  ;;  %v441_v48 = vrot.slane %v440_v45, 1 }
 0x19d   : > { %v431_v50 = vadd.f32 %v430_v47, %v423_v46  ;;  %v442_v51 = vadd.f32 %v441_v48, %v440_v45 }
 0x19f   : > { %432 = vst [vmem:[#allocation2] sm:$0x1] %v431_v50  ;;  %v443_v52 = vadd.f32 %v442_v51, %v433_v49 }
 0x1a1   : > { %444 = vst [vmem:[#allocation3] sm:$0x1] %v443_v52 }
 0x1a2 PF: > { %p445_p12 = scmp.eq.s32.totalorder %s1248_s25, 1 }
 0x1a4   : > { %p446_p1 = pnand %p445_p12, %p316_p2 }
 0x1a5   : > { %v459_v61 = vld [vmem:[%s1656_s3] sm:$0x1] (!%p446_p1) }
 0x1a6   : > { %449 = sbr.rel (%p446_p1) target bundleno = 451 (0x1c3), region = 64  ;;  %v450_v53 = vld [vmem:[#allocation2] sm:$0x1] (!%p446_p1) }
 0x1a7   : > { %v451_v55 = vmul.f32 (!%p446_p1), 0.041666668, %v450_v53  ;;  %v462_v0 = vld [vmem:[%s1657_s4] sm:$0x1] (!%p446_p1) }
 0x1a8   : > { %v452_v54 = vld [vmem:[#allocation3] sm:$0x1] (!%p446_p1) }
 0x1a9   : > { %v453_v56 = vmul.f32 (!%p446_p1), 0.041666668, %v452_v54  ;;  %v454_v57 = vmul.f32 (!%p446_p1), %v451_v55, %v451_v55 }
 0x1ab   : > { %v455_v58 = vsub.f32 (!%p446_p1), %v453_v56, %v454_v57 }
 0x1ad   : > { %v456_v59 = vmax.f32 %v455_v58, 0.0 }
 0x1af   : > { %v457_v60 = vadd.f32 1e-05, %v456_v59 }
 0x1b1   : > { %1040 = vrsqrt.f32 %v457_v60 }
 0x1bb   : > { %v1041_v62 = vpop.eup %1040 }
 0x1bc   : > { %v460_v63 = vmul.f32 %v1041_v62, %v459_v61 }
 0x1be   : > { %461 = vst [vmem:[#allocation4] sm:$0x1] %v460_v63  ;;  %v463_v1 = vmul.f32 %v460_v63, %v451_v55 }
 0x1c0   : > { %v464_v2 = vsub.f32 %v462_v0, %v463_v1 }
 0x1c2   : > { %465 = vst [vmem:[#allocation5] sm:$0x1] %v464_v2 }
 0x1c3 PF: > { %p736_p10 = scmp.ne.s32.totalorder %s1248_s25, 1 }
 0x1c4   : > { %v475_v3 = vld [vmem:[#allocation11] sm:$0xff] (!%p736_p10)  ;;  %v476_v4 = vld [vmem:[#allocation11 + $0x8] sm:$0xff] (!%p736_p10)  ;;  %v477_v5 = vld [vmem:[#allocation11 + $0x10] sm:$0xff] (!%p736_p10) }
 0x1c5   : > { %468 = sbr.rel (%p736_p10) target bundleno = 707 (0x2c3), region = 68  ;;  %v885_v6 = vpack.c.bf16 (!%p736_p10), %v476_v4, %v475_v3  ;;  %v478_v7 = vld [vmem:[#allocation11 + $0x18] sm:$0xff] (!%p736_p10)  ;;  %v479_v9 = vld [vmem:[#allocation11 + $0x20] sm:$0xff] (!%p736_p10)  ;;  %v480_v10 = vld [vmem:[#allocation11 + $0x28] sm:$0xff] (!%p736_p10) }
 0x1c6   : > { %v889_v8 = vpack.c.bf16 (!%p736_p10), %v478_v7, %v477_v5  ;;  %v893_v11 = vpack.c.bf16 (!%p736_p10), %v480_v10, %v479_v9  ;;  %v469_v12 = vld [vmem:[%s1533_s21] sm:$0xff] (!%p736_p10)  ;;  %v482_v15 = vld [vmem:[#allocation11 + $0x38] sm:$0xff] (!%p736_p10)  ;;  %v484_v19 = vld [vmem:[#allocation11 + $0x48] sm:$0xff] (!%p736_p10) }
 0x1c7   : > { %886 = vmatprep.subr.bf16.mxu0 (!%p736_p10), %v885_v6  ;;  %v471_v13 = vld [vmem:[%s1540_s16] sm:$0xff] (!%p736_p10)  ;;  %v486_v22 = vld [vmem:[#allocation11 + $0x58] sm:$0xff] (!%p736_p10)  ;;  %v488_v25 = vld [vmem:[#allocation11 + $0x68] sm:$0xff] (!%p736_p10) }
 0x1c8   : > { %888 = vmatpush3.bf16.msra.mxu0 (!%p736_p10), %v885_v6  ;;  %v481_v14 = vld [vmem:[#allocation11 + $0x30] sm:$0xff] (!%p736_p10)  ;;  %v473_v16 = vadd.f32 (!%p736_p10), %v471_v13, %v469_v12  ;;  %v483_v18 = vld [vmem:[#allocation11 + $0x40] sm:$0xff] (!%p736_p10)  ;;  %v490_v28 = vld [vmem:[#allocation11 + $0x78] sm:$0xff] (!%p736_p10) }
 0x1c9   : > { %890 = vmatprep.subr.bf16.mxu0 (!%p736_p10), %v889_v8  ;;  %v897_v17 = vpack.c.bf16 (!%p736_p10), %v482_v15, %v481_v14  ;;  %v901_v20 = vpack.c.bf16 (!%p736_p10), %v484_v19, %v483_v18  ;;  %v485_v21 = vld [vmem:[#allocation11 + $0x50] sm:$0xff] (!%p736_p10)  ;;  %v487_v24 = vld [vmem:[#allocation11 + $0x60] sm:$0xff] (!%p736_p10)  ;;  %v470_v30 = vld [vmem:[%s1533_s21 + $0x8] sm:$0xff] (!%p736_p10) }
 0x1ca   : > { %850 = vmatprep.mubr.f32.mxu0 (!%p736_p10), %v473_v16  ;;  %v905_v23 = vpack.c.bf16 (!%p736_p10), %v486_v22, %v485_v21  ;;  %v909_v26 = vpack.c.bf16 (!%p736_p10), %v488_v25, %v487_v24  ;;  %v489_v27 = vld [vmem:[#allocation11 + $0x70] sm:$0xff] (!%p736_p10)  ;;  %v472_v31 = vld [vmem:[%s1540_s16 + $0x8] sm:$0xff] (!%p736_p10) }
 0x1cb   : > { %v913_v29 = vpack.c.bf16 (!%p736_p10), %v490_v28, %v489_v27  ;;  %v474_v32 = vadd.f32 (!%p736_p10), %v472_v31, %v470_v30  ;;  %v737_v33 = vld [vmem:[#allocation4] ss:$0 sm:$0xff] (!%p736_p10)  ;;  %v738_v35 = vld [vmem:[#allocation5] ss:$0 sm:$0xff] (!%p736_p10) }
 0x1cc   : > { %892 = vmatpush3.bf16.msra.mxu0 %v889_v8 }
 0x1cd   : > { %894 = vmatprep.subr.bf16.mxu0 %v893_v11 }
 0x1d0   : > { %896 = vmatpush3.bf16.msra.mxu0 %v893_v11 }
 0x1d1   : > { %898 = vmatprep.subr.bf16.mxu0 %v897_v17 }
 0x1d4   : > { %900 = vmatpush3.bf16.msra.mxu0 %v897_v17 }
 0x1d5   : > { %902 = vmatprep.subr.bf16.mxu0 %v901_v20 }
 0x1d8   : > { %904 = vmatpush3.bf16.msra.mxu0 %v901_v20 }
 0x1d9   : > { %906 = vmatprep.subr.bf16.mxu0 %v905_v23 }
 0x1dc   : > { %908 = vmatpush3.bf16.msra.mxu0 %v905_v23 }
 0x1dd   : > { %910 = vmatprep.subr.bf16.mxu0 %v909_v26 }
 0x1e0   : > { %912 = vmatpush3.bf16.msra.mxu0 %v909_v26 }
 0x1e1   : > { %914 = vmatprep.subr.bf16.mxu0 %v913_v29 }
 0x1e4   : > { %916 = vmatpush3.bf16.msra.mxu0 %v913_v29 }
 0x1e7   : > { %851 = vmatmul.mubr.f32.vlgmr.msra.gmra.mrb[0].mxu0 %v474_v32 }
 0x2ba   : > { %v852_v34 = vpop.f32.mrb[0].mxu0 }
 0x2bb   : > { %v574_v36 = vmul.f32 %v852_v34, %v737_v33  ;;  %v557_v37 = vpop.f32.mrb[1].mxu0 }
 0x2bc   : > { %v573_v38 = vmul.f32 %v737_v33, %v557_v37 }
 0x2bd   : > { %v583_v39 = vadd.f32 %v738_v35, %v574_v36 }
 0x2be   : > { %v582_v40 = vadd.f32 %v738_v35, %v573_v38 }
 0x2bf   : > { %v585_v41 = vadd.f32 %v583_v39, %v470_v30 }
 0x2c0   : > { %v584_v42 = vadd.f32 %v582_v40, %v469_v12 }
 0x2c1   : > { %587 = vst [vmem:[%s1557_s7 + $0x8] sm:$0xff] %v585_v41 }
 0x2c2   : > { %586 = vst [vmem:[%s1557_s7] sm:$0xff] %v584_v42 }
 0x2c3 PF: > { %s596_s15 = smul.u32 %s1244_s24, %s1248_s25  ;;  %s603_s18 = sshll.u32 %s1557_s7, 4  ;;  %s1583_s18 = int_to_ptr.vmem [resolvable:$true] %s603_s18 }
 0x2c4   : > { %s1703_s17 = sld [smem:[#allocation28_spill]]  ;;  %s1592_s30 = scalar_lea.sflag [#allocation8], %s308_s10 }
 0x2c5   : > { %s746_s23 = sshll.u32 %s596_s15, 8  ;;  %s1130_s13 = scalar_lea.vmem %s1583_s18, 256 }
 0x2c6   : > { %p1131_p3 = scmp.ne.s32.totalorder %s1583_s18, %s1130_s13  ;;  %p1704_p9 = scmp.ne.s32.totalorder %s1683_s8, 0 }
 0x2c7   : > { %s1268_s24 = smov [#allocation12]  }
 0x2c8   : > { %p1132_p11 = pnand %p1131_p3, %p1704_p9  ;;  %s1134_s25 = sshll.u32 %s1268_s24, 4  ;;  %s1135_s25 = int_to_ptr.vmem [resolvable:$false] %s1134_s25 }
 0x2c9   : > { %s1136_s11 = scalar_lea.vmem %s1135_s25, 512  ;;  %p1137_p7 = scmp.lt.s32.totalorder %s1583_s18, %s1135_s25 }
 0x2ca   : > { %s1588_s0 = scalar_lea.hbm %s1703_s17, %s746_s23  ;;  %p1133_p6 = pneg %p1132_p11 }
 0x2cb   : > { %p1138_p4 = scmp.lt.s32.totalorder %s1136_s11, %s1130_s13 }
 0x2cd   : > { %p1139_p13 = por %p1138_p4, %p1137_p7 }
 0x2cf   : > { %p1140_p0 = pnand %p1139_p13, %p1133_p6 }
 0x2d1   : > { %1143 = shalt.err (!%p1140_p0)
}
 0x2d2   : > { %s1144_s21 = scalar_lea.hbm %s1588_s0, 256  ;;  %s1148_s16 = scalar_lea.hbm %s1703_s17, 512 }
 0x2d3   : > { %p1145_p2 = scmp.ne.s32.totalorder %s1588_s0, %s1144_s21  ;;  %p1149_p12 = scmp.lt.u32.totalorder %s1588_s0, %s1703_s17 }
 0x2d4   : > { %p1150_p1 = scmp.lt.u32.totalorder %s1148_s16, %s1144_s21  ;;  %p1152_p3 = scmp.lt.u32.totalorder %s1144_s21, %s1588_s0 }
 0x2d5   : > { %p1146_p5 = pnand %p1145_p2, %p1704_p9 }
 0x2d6   : > { %p1151_p10 = por %p1150_p1, %p1149_p12 }
 0x2d7   : > { %p1147_p8 = pneg %p1146_p5 }
 0x2d8   : > { %p1153_p11 = por %p1152_p3, %p1151_p10 }
 0x2da   : > { %p1154_p6 = pnand %p1153_p11, %p1147_p8 }
 0x2dc   : > { %1157 = shalt.err (!%p1154_p6)
}
 0x2dd   : > { %s1269_s7 = smov 128   ;;  %s1270_s29 = smov 8  }
 0x2de   : > { %925 = dma.vmem_to_hbm [thread:$0]  (%p1704_p9), %s1583_s18, 256, %s1588_s0, %s1592_s30, %s1269_s7, %s1269_s7, %s1270_s29  }
 0x2df PF: > { %s1705_s6 = sld [smem:[#allocation17_spill]]  ;;  %s1706_s27 = sld [smem:[#allocation21_spill]] }
 0x2e0   : > { %p945_p7 = scmp.ge.s32.totalorder %s1260_s28, 2 }
 0x2e5   : > { %s618_s12 = sand.u32 1, %s1705_s6   ;;  %p1707_p4 = scmp.ne.s32.totalorder %s1706_s27, 0 }
 0x2e6   : > { %s619_s15 = scalar_lea.sflag [#allocation8], %s618_s12 }
 0x2e7   : > { %p939_p13 = pnand %p945_p7, %p1707_p4 }
 0x2e9   : > { %1215 = dma.done.wait (!%p939_p13), %s619_s15, 256  }
 0x2ea   : > { %1217 = vsyncadd (!%p939_p13), %s619_s15, 4294967040  ;;  %s24_s28 = sadd.s32 1, %s1260_s28   ;;  %s1708_s23 = sld [smem:[#allocation25_spill]] }
 0x2eb   : > { %p21_p0 = scmp.ge.s32.totalorder %s24_s28, 6   ;;  %s1709_s8 = sld [smem:[#allocation18_spill]] }
 0x2ec   : > { %s1710_s5 = sld [smem:[#allocation24_spill]]  ;;  %s1711_s24 = sld [smem:[#allocation19_spill]] }
 0x2ed   : > { %s1712_s25 = sld [smem:[#allocation20_spill]]  ;;  %s1713_s26 = sld [smem:[#allocation22_spill]] }
 0x2ee   : > { %s1714_s27 = sld [smem:[#allocation23_spill]]  ;;  %s1715_s18 = smov %s1224_s19 }
 0x2ef   : > { %s1716_s19 = smov %s1228_s20  ;;  %s1718_s21 = smov %s1236_s22 }
 0x2f0   : > { %s1717_s20 = smov %s1708_s23  ;;  %23 = sbr.rel (!%p21_p0) target bundleno = 15 (0xf), region = 118 }
 0x2f1   : > { %s1719_s22 = smov %s1709_s8 }
 0x2f2   : > { %s1720_s23 = smov %s1710_s5 }
 0x2f7   :  { %624 = vsyncpa [#allocation7], 1 }
 0x2f8   :  { %626 = vsyncpa [#allocation7 + $0x1], 1 }
 0x2f9   :  { %627 = vsyncpa [#allocation10], 1 }
 0x2fa   :  { %629 = vsyncpa [#allocation10 + $0x1], 1 }
 0x2fb   :  { %630 = vsyncpa [#allocation8], 1 }
 0x2fc   :  { %632 = vsyncpa [#allocation8 + $0x1], 1 }

</bundles_post_ra>
